<compile_context>
chip_gen: v6e
topology: v6e:2x2x1
jax: 0.10.0
libtpu: 0.0.40
codegen_flags: <defaults>
</compile_context>

<pallas_src>
import jax
import jax.numpy as jnp
from jax.experimental import pallas as pl
from jax.experimental.pallas import tpu as pltpu


HIDDEN1 = 400
HIDDEN2 = 300
H1_PAD = 512          # 400 padded to a lane multiple of 128
H2_PAD = 384          # 300 padded to a lane multiple of 128
STATE_ROWS = 3        # forward reshapes fc3 output to (1, 3) => 3 rows per state
IN_FEATURES = 2


def actor_kernel(x_ref, w2_ref, aux_ref, o_ref):
    # x_ref:   (1, 3, 2)          f32   one state per grid step
    # w2_ref:  (H1_PAD, H2_PAD)   bf16  fc2 weight, (in, out), zero padded
    # aux_ref: (5, H1_PAD)        f32   rows 0-1: w1 (2,512); row 2: b1 (512);
    #                                   row 3: [b2 | 0] (512); row 4: [w3 | 0] (512)
    # o_ref:   (1, 3, 1)          f32   softmax probabilities (column layout)
    x = x_ref[0]                                   # (3, 2)

    w1_r0 = aux_ref[0:1, :]                        # (1, 512)
    w1_r1 = aux_ref[1:2, :]                        # (1, 512)
    b1 = aux_ref[2:3, :]                           # (1, 512)
    b2 = aux_ref[3:4, 0:H2_PAD]                    # (1, 384)
    w3 = aux_ref[4:5, 0:H2_PAD]                    # (1, 384)

    # fc1 (K=2): two broadcast multiply-adds on the VPU; skip the MXU entirely.
    h1 = x[:, 0:1] * w1_r0 + x[:, 1:2] * w1_r1 + b1
    h1 = jnp.maximum(h1, 0.0)                      # (3, 512), padded cols stay 0

    # fc2: the only real matmul (MXU), bf16 operands, f32 accumulate.
    h2 = jnp.dot(h1.astype(jnp.bfloat16), w2_ref[...],
                 preferred_element_type=jnp.float32) + b2
    h2 = jnp.maximum(h2, 0.0)                      # (3, 384), padded cols stay 0

    # fc3 (out_features=1): VPU multiply + lane reduction instead of an M=1 matmul.
    # fc3 bias omitted: same scalar added to all 3 logits -> no effect after softmax.
    logits = jnp.sum(h2 * w3, axis=-1, keepdims=True)      # (3, 1)

    # softmax over the 3 logits (held along sublanes)
    m = jnp.max(logits, axis=0, keepdims=True)
    e = jnp.exp(logits - m)
    denom = jnp.sum(e, axis=0, keepdims=True)
    o_ref[0] = e * pl.reciprocal(denom, approx=False)      # (3, 1)


def actor_network2_forward_batched(x_batch, w2_packed, aux_packed):
    """x_batch: (N, 3, 2) f32 -> (N, 3) softmax probabilities per state."""
    n = x_batch.shape[0]
    out = pl.pallas_call(
        actor_kernel,
        out_shape=jax.ShapeDtypeStruct((n, STATE_ROWS, 1), jnp.float32),
        grid_spec=pltpu.PrefetchScalarGridSpec(
            num_scalar_prefetch=0,
            grid=(n,),
            in_specs=[
                pl.BlockSpec((1, STATE_ROWS, IN_FEATURES), lambda i: (i, 0, 0)),
                # constant index maps -> weights stay VMEM-resident across the grid
                pl.BlockSpec((H1_PAD, H2_PAD), lambda i: (0, 0)),
                pl.BlockSpec((5, H1_PAD), lambda i: (0, 0)),
            ],
            out_specs=pl.BlockSpec((1, STATE_ROWS, 1), lambda i: (i, 0, 0)),
        ),
        compiler_params=pltpu.CompilerParams(
            dimension_semantics=("parallel",)),
    )(x_batch, w2_packed, aux_packed)
    return out.reshape(n, STATE_ROWS)


def actor_network2_forward(x, w2_packed, aux_packed):
    """Single state, exactly the module's forward: (3, 2) -> (1, 3)."""
    return actor_network2_forward_batched(x[None], w2_packed, aux_packed).reshape(
        1, STATE_ROWS)


def init_params(key):
    """Deterministic init mirroring the PyTorch module's init ranges.

    fc1.weight ~ U(+-1/sqrt(400)), fc2.weight ~ U(+-1/sqrt(300)),
    fc3.weight ~ U(+-0.003); biases keep nn.Linear default U(+-1/sqrt(fan_in)).
    Weights stored transposed (in, out) except fc3 which stays (out, in) = (1, 300).
    """
    k1, k2, k3, k4, k5, k6 = jax.random.split(key, 6)
    w1 = jax.random.uniform(k1, (IN_FEATURES, HIDDEN1), jnp.float32,
                            minval=-1.0 / jnp.sqrt(float(HIDDEN1)),
                            maxval=1.0 / jnp.sqrt(float(HIDDEN1)))
    b1 = jax.random.uniform(k2, (1, HIDDEN1), jnp.float32,
                            minval=-1.0 / jnp.sqrt(float(IN_FEATURES)),
                            maxval=1.0 / jnp.sqrt(float(IN_FEATURES)))
    w2 = jax.random.uniform(k3, (HIDDEN1, HIDDEN2), jnp.float32,
                            minval=-1.0 / jnp.sqrt(float(HIDDEN2)),
                            maxval=1.0 / jnp.sqrt(float(HIDDEN2)))
    b2 = jax.random.uniform(k4, (1, HIDDEN2), jnp.float32,
                            minval=-1.0 / jnp.sqrt(float(HIDDEN1)),
                            maxval=1.0 / jnp.sqrt(float(HIDDEN1)))
    w3 = jax.random.uniform(k5, (1, HIDDEN2), jnp.float32,
                            minval=-0.003, maxval=0.003)
    b3 = jax.random.uniform(k6, (1, 1), jnp.float32,
                            minval=-1.0 / jnp.sqrt(float(HIDDEN2)),
                            maxval=1.0 / jnp.sqrt(float(HIDDEN2)))
    return w1, b1, w2, b2, w3, b3


def pack_params(w1, b1, w2, b2, w3):
    """One-time packing into the kernel layout (zero padding keeps math exact)."""
    aux = jnp.zeros((5, H1_PAD), jnp.float32)
    aux = aux.at[0:2, 0:HIDDEN1].set(w1)
    aux = aux.at[2, 0:HIDDEN1].set(b1.reshape(-1))
    aux = aux.at[3, 0:HIDDEN2].set(b2.reshape(-1))
    aux = aux.at[4, 0:HIDDEN2].set(w3.reshape(-1))
    w2p = jnp.zeros((H1_PAD, H2_PAD), jnp.float32).at[0:HIDDEN1, 0:HIDDEN2].set(w2)
    return w2p.astype(jnp.bfloat16), aux


def reference_forward(x, w1, b1, w2, b2, w3, b3):
    """Pure-JAX f32 reference identical to the PyTorch forward (includes fc3 bias)."""
    h = jnp.maximum(x @ w1 + b1, 0.0)
    h = jnp.maximum(h @ w2 + b2, 0.0)
    y = (h @ w3.T + b3).reshape(1, STATE_ROWS)
    return jax.nn.softmax(y, axis=-1)


if __name__ == "__main__":
    key = jax.random.PRNGKey(0)
    kx, kb, kp = jax.random.split(key, 3)
    params = init_params(kp)
    w1, b1, w2, b2, w3, b3 = params
    w2_packed, aux_packed = pack_params(w1, b1, w2, b2, w3)

    # single state, exactly the module's forward: (3, 2) -> (1, 3)
    x = jax.random.normal(kx, (STATE_ROWS, IN_FEATURES), jnp.float32)
    out = jax.block_until_ready(actor_network2_forward(x, w2_packed, aux_packed))
    ref = reference_forward(x, *params)
    assert out.shape == (1, STATE_ROWS)
    assert jnp.allclose(jnp.sum(out), 1.0, atol=1e-5)
    # bf16 fc2 weights -> loosened tolerance vs. the f32 reference
    assert jnp.allclose(out, ref, atol=2e-3, rtol=0.0), (out, ref)

    # batched path: many states per pallas_call, weights VMEM-resident across the grid
    N = 16
    xb = jax.random.normal(kb, (N, STATE_ROWS, IN_FEATURES), jnp.float32)
    outb = jax.block_until_ready(
        actor_network2_forward_batched(xb, w2_packed, aux_packed))
    refb = jnp.concatenate([reference_forward(xb[i], *params) for i in range(N)],
                           axis=0)
    assert outb.shape == (N, STATE_ROWS)
    assert jnp.allclose(jnp.sum(outb, axis=-1), 1.0, atol=1e-5)
    assert jnp.allclose(outb, refb, atol=2e-3, rtol=0.0), (outb, refb)

    print("KERNEL_OK")
</pallas_src>

<mosaic_0001>
module attributes {stable_mosaic.version = 11 : i64} {
  func.func @actor_kernel(%arg0: i32, %arg1: memref<1x3x2xf32, #tpu.memory_space<vmem>>, %arg2: memref<512x384xbf16, #tpu.memory_space<vmem>>, %arg3: memref<5x512xf32, #tpu.memory_space<vmem>>, %arg4: memref<1x3x1xf32, #tpu.memory_space<vmem>>) attributes {dimension_semantics = [#tpu.dimension_semantics<parallel>], iteration_bounds = array<i64: 1>, scalar_prefetch = 0 : i64, scratch_operands = 0 : i64, tpu.core_type = #tpu.core_type<tc>, window_params = [{transform_indices = @transform_0, window_bounds = array<i64: 1, 3, 2>}, {pipeline_mode = #tpu.pipeline_mode<synchronous>, transform_indices = @transform_1, window_bounds = array<i64: 512, 384>}, {pipeline_mode = #tpu.pipeline_mode<synchronous>, transform_indices = @transform_2, window_bounds = array<i64: 5, 512>}, {transform_indices = @transform_3, window_bounds = array<i64: 1, 3, 1>}]} {
    %c0 = arith.constant 0 : index
    %c0_0 = arith.constant 0 : index
    %c0_1 = arith.constant 0 : index
    %0 = vector.load %arg1[%c0, %c0_0, %c0_1] : memref<1x3x2xf32, #tpu.memory_space<vmem>>, vector<1x3x2xf32>
    %1 = vector.shape_cast %0 : vector<1x3x2xf32> to vector<3x2xf32>
    %c0_2 = arith.constant 0 : index
    %c0_3 = arith.constant 0 : index
    %2 = vector.load %arg3[%c0_2, %c0_3] : memref<5x512xf32, #tpu.memory_space<vmem>>, vector<1x512xf32>
    %c1 = arith.constant 1 : index
    %c0_4 = arith.constant 0 : index
    %3 = vector.load %arg3[%c1, %c0_4] : memref<5x512xf32, #tpu.memory_space<vmem>>, vector<1x512xf32>
    %c2 = arith.constant 2 : index
    %c0_5 = arith.constant 0 : index
    %4 = vector.load %arg3[%c2, %c0_5] : memref<5x512xf32, #tpu.memory_space<vmem>>, vector<1x512xf32>
    %c3 = arith.constant 3 : index
    %c0_6 = arith.constant 0 : index
    %5 = vector.load %arg3[%c3, %c0_6] : memref<5x512xf32, #tpu.memory_space<vmem>>, vector<1x384xf32>
    %c4 = arith.constant 4 : index
    %c0_7 = arith.constant 0 : index
    %6 = vector.load %arg3[%c4, %c0_7] : memref<5x512xf32, #tpu.memory_space<vmem>>, vector<1x384xf32>
    %7 = vector.extract_strided_slice %1 {offsets = [0, 0], sizes = [3, 1], strides = [1, 1]} : vector<3x2xf32> to vector<3x1xf32>
    %8 = vector.broadcast %7 : vector<3x1xf32> to vector<3x512xf32>
    %9 = vector.broadcast %2 : vector<1x512xf32> to vector<3x512xf32>
    %10 = arith.mulf %8, %9 : vector<3x512xf32>
    %11 = vector.extract_strided_slice %1 {offsets = [0, 1], sizes = [3, 1], strides = [1, 1]} : vector<3x2xf32> to vector<3x1xf32>
    %12 = vector.broadcast %11 : vector<3x1xf32> to vector<3x512xf32>
    %13 = vector.broadcast %3 : vector<1x512xf32> to vector<3x512xf32>
    %14 = arith.mulf %12, %13 : vector<3x512xf32>
    %15 = arith.addf %10, %14 : vector<3x512xf32>
    %16 = vector.broadcast %4 : vector<1x512xf32> to vector<3x512xf32>
    %17 = arith.addf %15, %16 : vector<3x512xf32>
    %cst = arith.constant 0.000000e+00 : f32
    %18 = vector.broadcast %cst : f32 to vector<3x512xf32>
    %19 = arith.maximumf %17, %18 : vector<3x512xf32>
    %20 = arith.truncf %19 : vector<3x512xf32> to vector<3x512xbf16>
    %c0_8 = arith.constant 0 : index
    %c0_9 = arith.constant 0 : index
    %21 = vector.load %arg2[%c0_8, %c0_9] : memref<512x384xbf16, #tpu.memory_space<vmem>>, vector<512x384xbf16>
    %cst_10 = arith.constant dense<0.000000e+00> : vector<3x384xf32>
    %22 = tpu.matmul %20, %21, %cst_10 {dimension_numbers = #tpu.dot_dimension_numbers<[1], [0], [0], [1], [0, 0, 1, 1], [], []>} : vector<3x512xbf16>, vector<512x384xbf16>, vector<3x384xf32> -> vector<3x384xf32>
    %23 = vector.broadcast %5 : vector<1x384xf32> to vector<3x384xf32>
    %24 = arith.addf %22, %23 : vector<3x384xf32>
    %cst_11 = arith.constant 0.000000e+00 : f32
    %25 = vector.broadcast %cst_11 : f32 to vector<3x384xf32>
    %26 = arith.maximumf %24, %25 : vector<3x384xf32>
    %27 = vector.broadcast %6 : vector<1x384xf32> to vector<3x384xf32>
    %28 = arith.mulf %26, %27 : vector<3x384xf32>
    %cst_12 = arith.constant dense<0.000000e+00> : vector<3xf32>
    %29 = vector.multi_reduction <add>, %28, %cst_12 [1] : vector<3x384xf32> to vector<3xf32>
    %30 = vector.shape_cast %29 : vector<3xf32> to vector<3x1xf32>
    %cst_13 = arith.constant dense<0xFF800000> : vector<1xf32>
    %31 = vector.multi_reduction <maximumf>, %30, %cst_13 [0] : vector<3x1xf32> to vector<1xf32>
    %32 = vector.shape_cast %31 : vector<1xf32> to vector<1x1xf32>
    %33 = vector.broadcast %32 : vector<1x1xf32> to vector<3x1xf32>
    %34 = arith.subf %30, %33 : vector<3x1xf32>
    %35 = math.exp %34 : vector<3x1xf32>
    %cst_14 = arith.constant dense<0.000000e+00> : vector<1xf32>
    %36 = vector.multi_reduction <add>, %35, %cst_14 [0] : vector<3x1xf32> to vector<1xf32>
    %37 = vector.shape_cast %36 : vector<1xf32> to vector<1x1xf32>
    %38 = tpu.reciprocal %37 : vector<1x1xf32> -> vector<1x1xf32>
    %39 = vector.broadcast %38 : vector<1x1xf32> to vector<3x1xf32>
    %40 = arith.mulf %35, %39 : vector<3x1xf32>
    %c0_15 = arith.constant 0 : index
    %c0_16 = arith.constant 0 : index
    %c0_17 = arith.constant 0 : index
    %41 = vector.load %arg4[%c0_15, %c0_16, %c0_17] : memref<1x3x1xf32, #tpu.memory_space<vmem>>, vector<1x3x1xf32>
    %42 = vector.shape_cast %41 : vector<1x3x1xf32> to vector<3x1xf32>
    %43 = vector.shape_cast %40 : vector<3x1xf32> to vector<1x3x1xf32>
    tpu.vector_store %arg4[%c0_15, %c0_16, %c0_17], %43 {strides = array<i32>} : memref<1x3x1xf32, #tpu.memory_space<vmem>>, vector<1x3x1xf32>,
    return
  }
  func.func @transform_0(%arg0: i32) -> (i32, i32, i32) {
    %c0_i32 = arith.constant 0 : i32
    %c0_i32_0 = arith.constant 0 : i32
    %c0_i32_1 = arith.constant 0 : i32
    return %arg0, %c0_i32, %c0_i32_0 : i32, i32, i32
  }
  func.func @transform_1(%arg0: i32) -> (i32, i32) {
    %c0_i32 = arith.constant 0 : i32
    %c0_i32_0 = arith.constant 0 : i32
    %c0_i32_1 = arith.constant 0 : i32
    return %c0_i32, %c0_i32_0 : i32, i32
  }
  func.func @transform_2(%arg0: i32) -> (i32, i32) {
    %c0_i32 = arith.constant 0 : i32
    %c0_i32_0 = arith.constant 0 : i32
    %c0_i32_1 = arith.constant 0 : i32
    return %c0_i32, %c0_i32_0 : i32, i32
  }
  func.func @transform_3(%arg0: i32) -> (i32, i32, i32) {
    %c0_i32 = arith.constant 0 : i32
    %c0_i32_0 = arith.constant 0 : i32
    %c0_i32_1 = arith.constant 0 : i32
    return %arg0, %c0_i32, %c0_i32_0 : i32, i32, i32
  }
}

</mosaic_0001>

<bundles_post_ra>
// kernel: tpu_custom_call.1
= control target key start
LH: loop header
LB: loop body
LE: loop exit
PB: predicated region body
PF: predicated region fallthrough
CT: control target
= control target key end

     0   :  { %8 = vsyncpa [#allocation3], 0  ;;  %s1418_s0 = inlined_call_operand.vmem [shape: f32[1,3,2], index: 0, kind: input, shape index: {}]   ;;  %s1419_s1 = inlined_call_operand.hbm [shape: bf16[512,384], index: 1, kind: input, shape index: {}]   ;;  %s1420_s2 = inlined_call_operand.hbm [shape: f32[5,512], index: 2, kind: input, shape index: {}]   ;;  %s1421_s3 = inlined_call_operand.vmem [shape: f32[1,3,1], index: 3, kind: output, shape index: {}]  }
   0x1   :  { %9 = vsyncpa [#allocation5], 0  ;;  %s1346_s12 = smov [#allocation2]  }
   0x2   :  { %s17_s13 = sshll.u32 %s1346_s12, 4  ;;  %s18_s13 = int_to_ptr.vmem [resolvable:$true] %s17_s13 }
   0x3   :  { %s1310_s14 = scalar_lea.vmem %s18_s13, 12288  ;;  %p1315_p1 = scmp.lt.s32.totalorder %s18_s13, %s18_s13 }
   0x4   :  { %p1311_p0 = scmp.ne.s32.totalorder %s18_s13, %s1310_s14  ;;  %p1316_p2 = scmp.lt.s32.totalorder %s1310_s14, %s1310_s14 }
   0x6   :  { %p1317_p3 = por %p1316_p2, %p1315_p1 }
   0x8   :  { %p1318_p4 = pnand %p1317_p3, %p1311_p0 }
   0xa   :  { %1321 = shalt.err (!%p1318_p4)
}
   0xb   :  { %s1347_s15 = smov 192   ;;  %s1348_s16 = smov 12  }
   0xc   :  { %23 = dma.hbm_to_vmem [thread:$0]  %s1419_s1, 12288, %s18_s13, [#allocation3], %s1347_s15, %s1347_s15, %s1348_s16  }
   0xd   :  { %s1349_s19 = smov [#allocation4]  }
   0xe   :  { %s30_s20 = sshll.u32 %s1349_s19, 4  ;;  %s31_s20 = int_to_ptr.vmem [resolvable:$true] %s30_s20 }
   0xf   :  { %s1330_s21 = scalar_lea.vmem %s31_s20, 512  ;;  %p1335_p6 = scmp.lt.s32.totalorder %s31_s20, %s31_s20 }
  0x10   :  { %p1331_p5 = scmp.ne.s32.totalorder %s31_s20, %s1330_s21  ;;  %p1336_p7 = scmp.lt.s32.totalorder %s1330_s21, %s1330_s21 }
  0x12   :  { %p1337_p8 = por %p1336_p7, %p1335_p6 }
  0x14   :  { %p1338_p9 = pnand %p1337_p8, %p1331_p5 }
  0x16   :  { %1341 = shalt.err (!%p1338_p9)
}
  0x17   :  { %33 = dma.hbm_to_vmem [thread:$0]  %s1420_s2, 512, %s31_s20, [#allocation5]  }
  0x18   :  { %1342 = dma.done.wait [#allocation3], 12288  }
  0x19   :  { %1343 = vsyncadd [#allocation3], 4294955008 }
  0x1a   :  { %1344 = dma.done.wait [#allocation5], 512  }
  0x1b   :  { %1345 = vsyncadd [#allocation5], 4294966784  ;;  %v1350_v0 = vmov 0   ;;  %v41_v1 = vld [vmem:[%s1418_s0] sm:$0x7]  ;;  %v1351_v8 = vmov 1  }
  0x1c   :  { %1168 = vset.pattern.permute.xlu0 %v1350_v0  ;;  %v1170_v2 = vld [vmem:[#allocation2 + $0xac] ss:$12 sps:$4 sm:$0xff]   ;;  %v1174_v4 = vld [vmem:[#allocation2 + $0xa8] ss:$12 sps:$4 sm:$0xff]   ;;  %v1180_v9 = vld [vmem:[#allocation2 + $0x90] ss:$12 sps:$4 sm:$0xff]  }
  0x1d   :  { %53 = vperm.xlu0 %1168, %v41_v1   ;;  %v1172_v3 = vld [vmem:[#allocation2 + $0x22c] ss:$12 sps:$4 sm:$0xff]   ;;  %v1175_v5 = vld [vmem:[#allocation2 + $0x228] ss:$12 sps:$4 sm:$0xff]   ;;  %803 = vmatprep.subr.bf16.mxu0 %v1170_v2  ;;  %v1181_v10 = vld [vmem:[#allocation2 + $0x210] ss:$12 sps:$4 sm:$0xff]  }
  0x1e   :  { %v1176_v6 = vld [vmem:[#allocation2 + $0x94] ss:$12 sps:$4 sm:$0xff]   ;;  %844 = vmatprep.subr.bf16.mxu1 %v1172_v3  ;;  %804 = vmatpush1.bf16.msra.mxu0 %v1174_v4  ;;  %v1182_v11 = vld [vmem:[#allocation2 + $0x7c] ss:$12 sps:$4 sm:$0xff]   ;;  %v1186_v13 = vld [vmem:[#allocation2 + $0x78] ss:$12 sps:$4 sm:$0xff]  }
  0x1f   :  { %v1178_v7 = vld [vmem:[#allocation2 + $0x214] ss:$12 sps:$4 sm:$0xff]   ;;  %845 = vmatpush1.bf16.msra.mxu1 %v1175_v5  ;;  %805 = vmatprep.subr.bf16.mxu0 %v1176_v6  ;;  %v1184_v12 = vld [vmem:[#allocation2 + $0x1fc] ss:$12 sps:$4 sm:$0xff]   ;;  %v1187_v14 = vld [vmem:[#allocation2 + $0x1f8] ss:$12 sps:$4 sm:$0xff]   ;;  %v57_v5 = vlaneseq }
  0x20   :  { %846 = vmatprep.subr.bf16.mxu1 %v1178_v7  ;;  %v1188_v15 = vld [vmem:[#allocation2 + $0x64] ss:$12 sps:$4 sm:$0xff]   ;;  %v1192_v17 = vld [vmem:[#allocation2 + $0x60] ss:$12 sps:$4 sm:$0xff]   ;;  %v1198_v21 = vld [vmem:[#allocation2 + $0x48] ss:$12 sps:$4 sm:$0xff]  }
  0x21   :  { %1169 = vset.pattern.permute.xlu0 %v1351_v8  ;;  %v1190_v16 = vld [vmem:[#allocation2 + $0x1e4] ss:$12 sps:$4 sm:$0xff]   ;;  %v1193_v18 = vld [vmem:[#allocation2 + $0x1e0] ss:$12 sps:$4 sm:$0xff]   ;;  %v1199_v22 = vld [vmem:[#allocation2 + $0x1c8] ss:$12 sps:$4 sm:$0xff]  }
  0x22   :  { %82 = vperm.xlu0 %1169, %v41_v1   ;;  %806 = vmatpush1.bf16.msra.mxu0 %v1180_v9  ;;  %v1194_v19 = vld [vmem:[#allocation2 + $0x4c] ss:$12 sps:$4 sm:$0xff]   ;;  %v1200_v23 = vld [vmem:[#allocation2 + $0x34] ss:$12 sps:$4 sm:$0xff]   ;;  %v1204_v25 = vld [vmem:[#allocation2 + $0x30] ss:$12 sps:$4 sm:$0xff]  }
  0x23   :  { %847 = vmatpush1.bf16.msra.mxu1 %v1181_v10  ;;  %807 = vmatprep.subr.bf16.mxu0 %v1182_v11  ;;  %v1196_v20 = vld [vmem:[#allocation2 + $0x1cc] ss:$12 sps:$4 sm:$0xff]   ;;  %v1202_v24 = vld [vmem:[#allocation2 + $0x1b4] ss:$12 sps:$4 sm:$0xff]   ;;  %v1205_v26 = vld [vmem:[#allocation2 + $0x1b0] ss:$12 sps:$4 sm:$0xff]  }
  0x24   :  { %848 = vmatprep.subr.bf16.mxu1 %v1184_v12  ;;  %v1206_v27 = vld [vmem:[#allocation2 + $0x1c] ss:$12 sps:$4 sm:$0xff]   ;;  %v1210_v29 = vld [vmem:[#allocation2 + $0x18] ss:$12 sps:$4 sm:$0xff]   ;;  %v1216_v33 = vld [vmem:[#allocation2] ss:$12 sps:$4 sm:$0xff]  }
  0x25   :  { %v1208_v28 = vld [vmem:[#allocation2 + $0x19c] ss:$12 sps:$4 sm:$0xff]   ;;  %v1211_v30 = vld [vmem:[#allocation2 + $0x198] ss:$12 sps:$4 sm:$0xff]   ;;  %v1217_v34 = vld [vmem:[#allocation2 + $0x180] ss:$12 sps:$4 sm:$0xff]  }
  0x26   :  { %808 = vmatpush1.bf16.msra.mxu0 %v1186_v13  ;;  %v1212_v31 = vld [vmem:[#allocation2 + $0x4] ss:$12 sps:$4 sm:$0xff]   ;;  %v1218_v35 = vld [vmem:[#allocation2 + $0x16c] ss:$12 sps:$4 sm:$0xff]   ;;  %v1222_v37 = vld [vmem:[#allocation2 + $0x168] ss:$12 sps:$4 sm:$0xff]  }
  0x27   :  { %849 = vmatpush1.bf16.msra.mxu1 %v1187_v14  ;;  %809 = vmatprep.subr.bf16.mxu0 %v1188_v15  ;;  %v1214_v32 = vld [vmem:[#allocation2 + $0x184] ss:$12 sps:$4 sm:$0xff]   ;;  %v1220_v36 = vld [vmem:[#allocation2 + $0x2ec] ss:$12 sps:$4 sm:$0xff]   ;;  %v1223_v38 = vld [vmem:[#allocation2 + $0x2e8] ss:$12 sps:$4 sm:$0xff]  }
  0x28   :  { %850 = vmatprep.subr.bf16.mxu1 %v1190_v16  ;;  %v1224_v39 = vld [vmem:[#allocation2 + $0x154] ss:$12 sps:$4 sm:$0xff]   ;;  %v1228_v41 = vld [vmem:[#allocation2 + $0x150] ss:$12 sps:$4 sm:$0xff]   ;;  %v1234_v45 = vld [vmem:[#allocation2 + $0x138] ss:$12 sps:$4 sm:$0xff]  }
  0x29   :  { %v1226_v40 = vld [vmem:[#allocation2 + $0x2d4] ss:$12 sps:$4 sm:$0xff]   ;;  %v1229_v42 = vld [vmem:[#allocation2 + $0x2d0] ss:$12 sps:$4 sm:$0xff]   ;;  %v1235_v46 = vld [vmem:[#allocation2 + $0x2b8] ss:$12 sps:$4 sm:$0xff]  }
  0x2a   :  { %810 = vmatpush1.bf16.msra.mxu0 %v1192_v17  ;;  %v1230_v43 = vld [vmem:[#allocation2 + $0x13c] ss:$12 sps:$4 sm:$0xff]   ;;  %v1236_v47 = vld [vmem:[#allocation2 + $0x124] ss:$12 sps:$4 sm:$0xff]   ;;  %v1240_v49 = vld [vmem:[#allocation2 + $0x120] ss:$12 sps:$4 sm:$0xff]  }
  0x2b   :  { %851 = vmatpush1.bf16.msra.mxu1 %v1193_v18  ;;  %811 = vmatprep.subr.bf16.mxu0 %v1194_v19  ;;  %v1232_v44 = vld [vmem:[#allocation2 + $0x2bc] ss:$12 sps:$4 sm:$0xff]   ;;  %v1238_v48 = vld [vmem:[#allocation2 + $0x2a4] ss:$12 sps:$4 sm:$0xff]   ;;  %v1241_v50 = vld [vmem:[#allocation2 + $0x2a0] ss:$12 sps:$4 sm:$0xff]  }
  0x2c   :  { %852 = vmatprep.subr.bf16.mxu1 %v1196_v20  ;;  %v1242_v51 = vld [vmem:[#allocation2 + $0x10c] ss:$12 sps:$4 sm:$0xff]   ;;  %v1246_v53 = vld [vmem:[#allocation2 + $0x108] ss:$12 sps:$4 sm:$0xff]   ;;  %v1252_v57 = vld [vmem:[#allocation2 + $0xf0] ss:$12 sps:$4 sm:$0xff]  }
  0x2d   :  { %v1244_v52 = vld [vmem:[#allocation2 + $0x28c] ss:$12 sps:$4 sm:$0xff]   ;;  %v1247_v54 = vld [vmem:[#allocation2 + $0x288] ss:$12 sps:$4 sm:$0xff]   ;;  %v1253_v58 = vld [vmem:[#allocation2 + $0x270] ss:$12 sps:$4 sm:$0xff]  }
  0x2e   :  { %812 = vmatpush1.bf16.msra.mxu0 %v1198_v21  ;;  %v1248_v55 = vld [vmem:[#allocation2 + $0xf4] ss:$12 sps:$4 sm:$0xff]   ;;  %v1254_v59 = vld [vmem:[#allocation2 + $0xdc] ss:$12 sps:$4 sm:$0xff]   ;;  %v1258_v61 = vld [vmem:[#allocation2 + $0xd8] ss:$12 sps:$4 sm:$0xff]  }
  0x2f   :  { %853 = vmatpush1.bf16.msra.mxu1 %v1199_v22  ;;  %813 = vmatprep.subr.bf16.mxu0 %v1200_v23  ;;  %v1250_v56 = vld [vmem:[#allocation2 + $0x274] ss:$12 sps:$4 sm:$0xff]   ;;  %v1256_v60 = vld [vmem:[#allocation2 + $0x25c] ss:$12 sps:$4 sm:$0xff]   ;;  %v1259_v62 = vld [vmem:[#allocation2 + $0x258] ss:$12 sps:$4 sm:$0xff]  }
  0x30   :  { %854 = vmatprep.subr.bf16.mxu1 %v1202_v24  ;;  %v1260_v63 = vld [vmem:[#allocation2 + $0xc4] ss:$12 sps:$4 sm:$0xff]   ;;  %v1264_v1 = vld [vmem:[#allocation2 + $0xc0] ss:$12 sps:$4 sm:$0xff]   ;;  %v58_v6 = vshrl.u32 %v57_v5, 7  ;;  %vm987_vm0 = vcmask 1042432  }
  0x31   :  { %v1262_v0 = vld [vmem:[#allocation2 + $0x244] ss:$12 sps:$4 sm:$0xff]   ;;  %v1265_v2 = vld [vmem:[#allocation2 + $0x240] ss:$12 sps:$4 sm:$0xff]   ;;  %vm1014_vm1 = vcmask 2048  }
  0x32   :  { %814 = vmatpush1.bf16.msra.mxu0 %v1204_v25  ;;  %v1266_v3 = vld [vmem:[#allocation2 + $0x170] ss:$12 sps:$4 sm:$0xff]   ;;  %v1381_v7 = vsub.s32 0, %v58_v6  ;;  %v1383_v8 = vsub.s32 1, %v58_v6  ;;  %v1385_v9 = vsub.s32 2, %v58_v6  ;;  %v71_v10 = vsub.s32 3, %v58_v6 }
  0x33   :  { %855 = vmatpush1.bf16.msra.mxu1 %v1205_v26  ;;  %815 = vmatprep.subr.bf16.mxu0 %v1206_v27  ;;  %v1267_v4 = vld [vmem:[#allocation2 + $0x2f0] ss:$12 sps:$4 sm:$0xff]   ;;  %v1286_v6 = vld [vmem:[#allocation2 + $0xf8] ss:$12 sps:$4 sm:$0xff]  }
  0x34   :  { %856 = vmatprep.subr.bf16.mxu1 %v1208_v28  ;;  %v42_v11 = vld [vmem:[#allocation4] ss:$8 sm:$0xf]  ;;  %v44_v12 = vld [vmem:[#allocation4 + $0x1] ss:$8 sm:$0xf] }
  0x35   :  { %v60_v14 = vrot.slane %v42_v11, %v1381_v7  ;;  %v64_v15 = vrot.slane %v42_v11, %v1383_v8  ;;  %v68_v16 = vrot.slane %v42_v11, %v1385_v9  ;;  %v72_v17 = vrot.slane %v42_v11, %v71_v10  ;;  %v46_v18 = vld [vmem:[#allocation4 + $0x2] ss:$8 sm:$0xf] }
  0x36   :  { %816 = vmatpush1.bf16.msra.mxu0 %v1210_v29  ;;  %v89_v19 = vrot.slane %v44_v12, %v1381_v7  ;;  %v93_v20 = vrot.slane %v44_v12, %v1383_v8  ;;  %v97_v21 = vrot.slane %v44_v12, %v1385_v9  ;;  %v101_v22 = vrot.slane %v44_v12, %v71_v10  ;;  %v1285_v5 = vld [vmem:[#allocation2 + $0x1d0] ss:$12 sps:$4 sm:$0xff]   ;;  %v1288_v11 = vld [vmem:[#allocation2 + $0x38] ss:$12 sps:$4 sm:$0xff]  }
  0x37   :  { %857 = vmatpush1.bf16.msra.mxu1 %v1211_v30  ;;  %817 = vmatprep.subr.bf16.mxu0 %v1212_v31  ;;  %v122_v23 = vrot.slane %v46_v18, %v1383_v8  ;;  %v130_v24 = vrot.slane %v46_v18, %v71_v10  ;;  %v118_v25 = vrot.slane %v46_v18, %v1381_v7  ;;  %v1287_v10 = vld [vmem:[#allocation2 + $0x278] ss:$12 sps:$4 sm:$0xff]  }
  0x38   :  { %858 = vmatprep.subr.bf16.mxu1 %v1214_v32  ;;  %v126_v26 = vrot.slane %v46_v18, %v1385_v9  ;;  %v1289_v12 = vld [vmem:[#allocation2 + $0x1b8] ss:$12 sps:$4 sm:$0xff]   ;;  %v1295_v18 = vld [vmem:[#allocation2 + $0x248] ss:$12 sps:$4 sm:$0xff]  }
  0x3a   :  { %818 = vmatpush1.bf16.msra.mxu0 %v1216_v33 }
  0x3b   :  { %859 = vmatpush1.bf16.msra.mxu1 %v1217_v34  ;;  %819 = vmatprep.subr.bf16.mxu0 %v1218_v35 }
  0x3c   :  { %860 = vmatprep.subr.bf16.mxu1 %v1220_v36 }
  0x3e   :  { %820 = vmatpush2.bf16.msra.mxu0 %v1222_v37 }
  0x3f   :  { %861 = vmatpush2.bf16.msra.mxu1 %v1223_v38  ;;  %821 = vmatprep.subr.bf16.mxu0 %v1224_v39 }
  0x40   :  { %862 = vmatprep.subr.bf16.mxu1 %v1226_v40 }
  0x42   :  { %822 = vmatpush2.bf16.msra.mxu0 %v1228_v41 }
  0x43   :  { %863 = vmatpush2.bf16.msra.mxu1 %v1229_v42  ;;  %823 = vmatprep.subr.bf16.mxu0 %v1230_v43 }
  0x44   :  { %864 = vmatprep.subr.bf16.mxu1 %v1232_v44 }
  0x46   :  { %824 = vmatpush2.bf16.msra.mxu0 %v1234_v45 }
  0x47   :  { %865 = vmatpush2.bf16.msra.mxu1 %v1235_v46  ;;  %825 = vmatprep.subr.bf16.mxu0 %v1236_v47 }
  0x48   :  { %866 = vmatprep.subr.bf16.mxu1 %v1238_v48 }
  0x4a   :  { %826 = vmatpush2.bf16.msra.mxu0 %v1240_v49 }
  0x4b   :  { %867 = vmatpush2.bf16.msra.mxu1 %v1241_v50  ;;  %827 = vmatprep.subr.bf16.mxu0 %v1242_v51 }
  0x4c   :  { %868 = vmatprep.subr.bf16.mxu1 %v1244_v52  ;;  %v1268_v52 = vld [vmem:[#allocation2 + $0xb0] ss:$12 sps:$4 sm:$0xff]  }
  0x4e   :  { %828 = vmatpush2.bf16.msra.mxu0 %v1246_v53  ;;  %v1269_v53 = vld [vmem:[#allocation2 + $0x230] ss:$12 sps:$4 sm:$0xff]  }
  0x4f   :  { %869 = vmatpush2.bf16.msra.mxu1 %v1247_v54  ;;  %829 = vmatprep.subr.bf16.mxu0 %v1248_v55  ;;  %v1270_v54 = vld [vmem:[#allocation2 + $0x158] ss:$12 sps:$4 sm:$0xff]  }
  0x50   :  { %870 = vmatprep.subr.bf16.mxu1 %v1250_v56  ;;  %v1271_v55 = vld [vmem:[#allocation2 + $0x2d8] ss:$12 sps:$4 sm:$0xff]  }
  0x51   :  { %v1272_v56 = vld [vmem:[#allocation2 + $0x98] ss:$12 sps:$4 sm:$0xff]  }
  0x52   :  { %830 = vmatpush2.bf16.msra.mxu0 %v1252_v57  ;;  %v1273_v57 = vld [vmem:[#allocation2 + $0x218] ss:$12 sps:$4 sm:$0xff]  }
  0x53   :  { %871 = vmatpush2.bf16.msra.mxu1 %v1253_v58  ;;  %831 = vmatprep.subr.bf16.mxu0 %v1254_v59  ;;  %v1274_v58 = vld [vmem:[#allocation2 + $0x140] ss:$12 sps:$4 sm:$0xff]  }
  0x54   :  { %872 = vmatprep.subr.bf16.mxu1 %v1256_v60  ;;  %v1275_v59 = vld [vmem:[#allocation2 + $0x2c0] ss:$12 sps:$4 sm:$0xff]  }
  0x55   :  { %v1276_v60 = vld [vmem:[#allocation2 + $0x80] ss:$12 sps:$4 sm:$0xff]  }
  0x56   :  { %832 = vmatpush2.bf16.msra.mxu0 %v1258_v61  ;;  %v1277_v61 = vld [vmem:[#allocation2 + $0x200] ss:$12 sps:$4 sm:$0xff]  }
  0x57   :  { %873 = vmatpush2.bf16.msra.mxu1 %v1259_v62  ;;  %833 = vmatprep.subr.bf16.mxu0 %v1260_v63  ;;  %v1278_v62 = vld [vmem:[#allocation2 + $0x128] ss:$12 sps:$4 sm:$0xff]  }
  0x58   :  { %874 = vmatprep.subr.bf16.mxu1 %v1262_v0  ;;  %v1279_v63 = vld [vmem:[#allocation2 + $0x2a8] ss:$12 sps:$4 sm:$0xff]  }
  0x59   :  { %v1280_v0 = vld [vmem:[#allocation2 + $0x68] ss:$12 sps:$4 sm:$0xff]  }
  0x5a   :  { %834 = vmatpush2.bf16.msra.mxu0 %v1264_v1  ;;  %v1281_v1 = vld [vmem:[#allocation2 + $0x1e8] ss:$12 sps:$4 sm:$0xff]  }
  0x5b   :  { %875 = vmatpush2.bf16.msra.mxu1 %v1265_v2  ;;  %1118 = vmatprep.subr.bf16.mxu0 %v1266_v3  ;;  %v1282_v2 = vld [vmem:[#allocation2 + $0x110] ss:$12 sps:$4 sm:$0xff]  }
  0x5c   :  { %1140 = vmatprep.subr.bf16.mxu1 %v1267_v4  ;;  %v1283_v3 = vld [vmem:[#allocation2 + $0x290] ss:$12 sps:$4 sm:$0xff]  }
  0x5d   :  { %v1284_v4 = vld [vmem:[#allocation2 + $0x50] ss:$12 sps:$4 sm:$0xff]  }
  0x98   :  { %v54_v13 = vpop.permute.xlu0 %53 }
  0x99   :  { %v77_v27 = vmul.f32 %v60_v14, %v54_v13  ;;  %v78_v28 = vmul.f32 %v64_v15, %v54_v13  ;;  %v79_v29 = vmul.f32 %v68_v16, %v54_v13  ;;  %v80_v30 = vmul.f32 %v72_v17, %v54_v13  ;;  %v1290_v13 = vld [vmem:[#allocation2 + $0xe0] ss:$12 sps:$4 sm:$0xff]   ;;  %v1294_v17 = vld [vmem:[#allocation2 + $0xc8] ss:$12 sps:$4 sm:$0xff]  }
  0x9a   :  { %v1291_v14 = vld [vmem:[#allocation2 + $0x260] ss:$12 sps:$4 sm:$0xff]  }
  0x9b   :  { %v1292_v15 = vld [vmem:[#allocation2 + $0x20] ss:$12 sps:$4 sm:$0xff]  }
  0x9c   :  { %v1293_v16 = vld [vmem:[#allocation2 + $0x1a0] ss:$12 sps:$4 sm:$0xff]  }
  0x9d   :  { %v83_v31 = vpop.permute.xlu0 %82 }
  0x9e   :  { %v106_v32 = vmul.f32 %v89_v19, %v83_v31  ;;  %v107_v33 = vmul.f32 %v93_v20, %v83_v31  ;;  %v108_v34 = vmul.f32 %v97_v21, %v83_v31  ;;  %v109_v35 = vmul.f32 %v101_v22, %v83_v31  ;;  %v1296_v19 = vld [vmem:[#allocation2 + $0x8] ss:$12 sps:$4 sm:$0xff]  }
  0x9f   :  { %v1297_v20 = vld [vmem:[#allocation2 + $0x188] ss:$12 sps:$4 sm:$0xff]  }
  0xa0   :  { %v110_v36 = vadd.f32 %v106_v32, %v77_v27  ;;  %v112_v37 = vadd.f32 %v108_v34, %v79_v29  ;;  %v111_v38 = vadd.f32 %v107_v33, %v78_v28  ;;  %v113_v39 = vadd.f32 %v109_v35, %v80_v30  ;;  %v48_v29 = vld [vmem:[#allocation4 + $0x3] ss:$8 sm:$0x7] }
  0xa1   :  { %v283_v30 = vrot.slane %v48_v29, %v1383_v8  ;;  %v279_v31 = vrot.slane %v48_v29, %v1381_v7 }
  0xa2   :  { %v136_v40 = vadd.f32 %v122_v23, %v111_v38  ;;  %v138_v41 = vadd.f32 %v130_v24, %v113_v39  ;;  %v135_v42 = vadd.f32 %v118_v25, %v110_v36  ;;  %v137_v43 = vadd.f32 %v126_v26, %v112_v37  ;;  %v50_v36 = vld [vmem:[#allocation4 + $0x4] ss:$8 sm:$0x7] }
  0xa4   :  { %v140_v44 = vmax.f32 %v136_v40, 0.0  ;;  %v142_v45 = vmax.f32 %v138_v41, 0.0  ;;  %v139_v46 = vmax.f32 %v135_v42, 0.0  ;;  %v141_v47 = vmax.f32 %v137_v43, 0.0 }
  0xa5   :  { %v976_v40 = vrot.slane %v50_v36, %v1383_v8  ;;  %v287_v41 = vrot.slane %v48_v29, %v1385_v9 }
  0xa6   :  { %v144_v48 = vpack.c.bf16 %v140_v44, %v140_v44  ;;  %v146_v49 = vpack.c.bf16 %v142_v45, %v142_v45  ;;  %v1396_v50 = vpack.c.bf16 %v139_v46, %v139_v46  ;;  %v1398_v51 = vpack.c.bf16 %v141_v47, %v141_v47 }
  0xa7   :  { %v972_v45 = vrot.slane %v50_v36, %v1381_v7 }
  0xa8   :  { %835 = vmatprep.mubr.bf16.mxu0 %v144_v48  ;;  %876 = vmatprep.mubr.bf16.mxu1 %v146_v49 }
  0xa9   :  { %836 = vmatmul.mubr.bf16.vlgmr.msra.gmra.mxu0 %v1396_v50  ;;  %877 = vmatmul.mubr.bf16.vlgmr.msra.gmra.mxu1 %v1398_v51 }
  0xaa   :  { %1119 = vmatpush3.bf16.msra.mxu0 %v1268_v52  ;;  %1141 = vmatpush3.bf16.msra.mxu1 %v1269_v53 }
  0xab   :  { %917 = vmatprep.mubr.bf16.mxu0 %v144_v48  ;;  %957 = vmatprep.mubr.bf16.mxu1 %v146_v49 }
  0xac   :  { %1120 = vmatprep.subr.bf16.mxu0 %v1270_v54  ;;  %1142 = vmatprep.subr.bf16.mxu1 %v1271_v55 }
  0xae   :  { %1121 = vmatpush3.bf16.msra.mxu0 %v1272_v56  ;;  %1143 = vmatpush3.bf16.msra.mxu1 %v1273_v57  ;;  %v980_v56 = vrot.slane %v50_v36, %v1385_v9 }
  0xaf   :  { %1122 = vmatprep.subr.bf16.mxu0 %v1274_v58  ;;  %1144 = vmatprep.subr.bf16.mxu1 %v1275_v59 }
  0xb2   :  { %1123 = vmatpush3.bf16.msra.mxu0 %v1276_v60  ;;  %1145 = vmatpush3.bf16.msra.mxu1 %v1277_v61 }
  0xb3   :  { %1124 = vmatprep.subr.bf16.mxu0 %v1278_v62  ;;  %1146 = vmatprep.subr.bf16.mxu1 %v1279_v63 }
  0xb6   :  { %1125 = vmatpush3.bf16.msra.mxu0 %v1280_v0  ;;  %1147 = vmatpush3.bf16.msra.mxu1 %v1281_v1 }
  0xb7   :  { %1126 = vmatprep.subr.bf16.mxu0 %v1282_v2  ;;  %1148 = vmatprep.subr.bf16.mxu1 %v1283_v3 }
  0xba   :  { %1127 = vmatpush3.bf16.msra.mxu0 %v1284_v4  ;;  %1149 = vmatpush3.bf16.msra.mxu1 %v1285_v5 }
  0xbb   :  { %1128 = vmatprep.subr.bf16.mxu0 %v1286_v6  ;;  %1150 = vmatprep.subr.bf16.mxu1 %v1287_v10 }
  0xbe   :  { %1129 = vmatpush3.bf16.msra.mxu0 %v1288_v11  ;;  %1151 = vmatpush3.bf16.msra.mxu1 %v1289_v12 }
  0xbf   :  { %1130 = vmatprep.subr.bf16.mxu0 %v1290_v13  ;;  %1152 = vmatprep.subr.bf16.mxu1 %v1291_v14 }
  0xc2   :  { %1131 = vmatpush3.bf16.msra.mxu0 %v1292_v15  ;;  %1153 = vmatpush3.bf16.msra.mxu1 %v1293_v16 }
  0xc3   :  { %1132 = vmatprep.subr.bf16.mxu0 %v1294_v17  ;;  %1154 = vmatprep.subr.bf16.mxu1 %v1295_v18 }
  0xc6   :  { %1133 = vmatpush3.bf16.msra.mxu0 %v1296_v19  ;;  %1155 = vmatpush3.bf16.msra.mxu1 %v1297_v20 }
  0xc9   :  { %918 = vmatmul.mubr.bf16.vlgmr.msra.gmra.mxu0 %v1396_v50  ;;  %958 = vmatmul.mubr.bf16.vlgmr.msra.gmra.mxu1 %v1398_v51 }
 0x169   :  { %v837_v21 = vpop.f32.mrf.mxu0  ;;  %v878_v22 = vpop.f32.mrf.mxu1 }
 0x16a   :  { %v838_v33 = vadd.f32 %v837_v21, %v279_v31 }
 0x16b   :  { %v839_v23 = vpop.f32.mrf.mxu0  ;;  %v880_v24 = vpop.f32.mrf.mxu1 }
 0x16c   :  { %v840_v32 = vadd.f32 %v839_v23, %v283_v30  ;;  %v879_v35 = vadd.f32 %v878_v22, %v838_v33 }
 0x16d   :  { %v841_v25 = vpop.f32.mrf.mxu0  ;;  %v882_v26 = vpop.f32.mrf.mxu1 }
 0x16e   :  { %v881_v34 = vadd.f32 %v880_v24, %v840_v32  ;;  %v965_v44 = vmax.f32 %v879_v35, 0.0 }
 0x16f   :  { %v842_v27 = vpop.f32.mrf.mxu0  ;;  %v883_v28 = vpop.f32.mrf.mxu1 }
 0x170   :  { %v966_v39 = vmax.f32 %v881_v34, 0.0  ;;  %v984_v54 = vmul.f32 %v972_v45, %v965_v44 }
 0x172   :  { %v985_v49 = vmul.f32 %v976_v40, %v966_v39  ;;  %v988_v59 = vsel %vm987_vm0, %v984_v54, 0.0 }
 0x174   :  { %v989_v57 = vsel %vm987_vm0, %v985_v49, 0.0 }
 0x175   :  { %v990_v7 = vadd.f32 %v989_v57, %v988_v59 }
 0x189   :  { %v1134_v37 = vpop.f32.mrf.mxu0  ;;  %v1156_v38 = vpop.f32.mrf.mxu1 }
 0x18b   :  { %v1135_v42 = vpop.f32.mrf.mxu0  ;;  %v1157_v43 = vpop.f32.mrf.mxu1 }
 0x18c   :  { %v1136_v46 = vadd.f32 %v1135_v42, %v1134_v37  ;;  %v1158_v51 = vadd.f32 %v1157_v43, %v1156_v38 }
 0x18d   :  { %v1137_v47 = vpop.f32.mrf.mxu0  ;;  %v1159_v48 = vpop.f32.mrf.mxu1 }
 0x18e   :  { %v920_v50 = vadd.f32 %v1136_v46, %v287_v41 }
 0x18f   :  { %v1138_v52 = vpop.f32.mrf.mxu0  ;;  %v1160_v53 = vpop.f32.mrf.mxu1 }
 0x190   :  { %v960_v55 = vadd.f32 %v1158_v51, %v920_v50 }
 0x192   :  { %v967_v8 = vmax.f32 %v960_v55, 0.0 }
 0x194   :  { %v986_v58 = vmul.f32 %v980_v56, %v967_v8 }
 0x196   :  { %v991_v60 = vsel %vm987_vm0, %v986_v58, 0.0 }
 0x197   :  { %v992_v61 = vadd.f32 %v991_v60, %v990_v7 }
 0x199   :  { %993 = vadd.xlane.f32.xlu1 %v992_v61 }
 0x222   :  { %v994_v62 = vpop.xlane.xlu1 %993 }
 0x223   :  { %v995_v63 = vsel %vm987_vm0, %v994_v62, -inf }
 0x224   :  { %v996_v0 = vrot.slane %v995_v63, 4 }
 0x226   :  { %v997_v1 = vmax.f32 %v995_v63, %v996_v0 }
 0x228   :  { %v998_v2 = vrot.slane %v997_v1, 2 }
 0x22a   :  { %v999_v3 = vmax.f32 %v997_v1, %v998_v2 }
 0x22c   :  { %v1000_v9 = vrot.slane %v999_v3, 1 }
 0x22e   :  { %v1001_v4 = vmax.f32 %v999_v3, %v1000_v9 }
 0x230   :  { %v1002_v5 = vsub.f32 %v994_v62, %v1001_v4 }
 0x232   :  { %v1003_v6 = vmul.f32 1.442695, %v1002_v5 }
 0x234   :  { %1298 = vpow2.f32 %v1003_v6 }
 0x241   :  { %v1299_v10 = vpop.eup %1298 }
 0x242   :  { %v1005_v11 = vsel %vm987_vm0, %v1299_v10, 0.0 }
 0x243   :  { %v1006_v12 = vrot.slane %v1005_v11, 4 }
 0x245   :  { %v1007_v13 = vadd.f32 %v1006_v12, %v1005_v11 }
 0x247   :  { %v1008_v14 = vrot.slane %v1007_v13, 2 }
 0x249   :  { %v1009_v15 = vadd.f32 %v1008_v14, %v1007_v13 }
 0x24b   :  { %v1010_v16 = vrot.slane %v1009_v15, 1 }
 0x24d   :  { %v1011_v17 = vadd.f32 %v1010_v16, %v1009_v15 }
 0x24f   :  { %1300 = vrcp.f32 %v1011_v17 }
 0x25c   :  { %v1301_v18 = vpop.eup %1300 }
 0x25d   :  { %v1013_v19 = vmul.f32 %v1301_v18, %v1299_v10 }
 0x25f   :  { %1015 = vst.msk [vmem:[%s1421_s3] sm:$0x7] %vm1014_vm1, %v1013_v19 }
 0x260   :  { %1020 = vsyncpa [#allocation3], 1 }
 0x261   :  { %1021 = vsyncpa [#allocation5], 1 }

</bundles_post_ra>
